<compile_context>
chip_gen: v6e
topology: v6e:2x2x1
jax: 0.10.0
libtpu: 0.0.40
codegen_flags: <defaults>
</compile_context>

<pallas_src>
import functools

import jax
import jax.numpy as jnp
from jax import lax
from jax.experimental import pallas as pl
from jax.experimental.pallas import tpu as pltpu


def _round_up(x, m):
    return ((x + m - 1) // m) * m


def _pool_rows_kernel(x_ref, sum_ref, max_ref, sum_acc, max_acc, *,
                      row_len, tile_s, acc_w):
    """Streaming per-row sum & max over the lane axis.

    x_ref:   (R, tile_s)  current input tile (auto-pipelined from HBM)
    sum_ref: (R, 1), max_ref: (R, 1)  outputs, written on the last s-step
    sum_acc / max_acc: (R, acc_w) f32 running accumulators (VMEM scratch)
    """
    s = pl.program_id(1)
    last = pl.num_programs(1) - 1
    n_chunks = tile_s // acc_w

    @pl.when(s == 0)
    def _init():
        sum_acc[...] = jnp.zeros(sum_acc.shape, sum_acc.dtype)
        max_acc[...] = jnp.full(max_acc.shape, -jnp.inf, dtype=max_acc.dtype)

    def _accumulate(masked):
        def body(i, carry):
            sv, mv = carry
            off = pl.multiple_of(i * acc_w, acc_w)
            chunk = x_ref[:, pl.ds(off, acc_w)].astype(jnp.float32)
            if masked:
                lane = lax.broadcasted_iota(jnp.int32, chunk.shape, 1)
                valid = (s * tile_s + off + lane) < row_len
                sv = sv + jnp.where(valid, chunk, 0.0)
                mv = jnp.maximum(mv, jnp.where(valid, chunk, -jnp.inf))
            else:
                sv = sv + chunk
                mv = jnp.maximum(mv, chunk)
            return sv, mv

        init = (sum_acc[...], max_acc[...])
        sv, mv = lax.fori_loop(0, n_chunks, body, init,
                               unroll=min(n_chunks, 4))
        sum_acc[...] = sv
        max_acc[...] = mv

    if row_len % tile_s == 0:
        # No ragged tail anywhere: always the cheap unmasked path.
        _accumulate(masked=False)
    else:
        @pl.when(s != last)
        def _full_tiles():
            _accumulate(masked=False)

        @pl.when(s == last)
        def _tail_tile():
            _accumulate(masked=True)

    @pl.when(s == last)
    def _finalize():
        # Single cross-lane (XLU) reduction per row block.
        sum_ref[...] = jnp.sum(sum_acc[...], axis=-1, keepdims=True)
        max_ref[...] = jnp.max(max_acc[...], axis=-1, keepdims=True)


def _plan(rows, spatial, user_tile_s, target_bytes):
    """Pick (n_split, row_len, rows_eff, tile_s, acc_w, R)."""
    # Split each row in halves when the parallel row axis would otherwise have
    # a single block, so both TensorCores (v7x megacore) get work.
    n_split = 1
    if pl.cdiv(rows, 8) < 2 and spatial % 2 == 0 and spatial >= 2048:
        n_split = 2
    row_len = spatial // n_split
    rows_eff = rows * n_split

    # Lane tile: multiple of 128, capped at the row length and at ~target
    # bytes for an 8-row block.
    lane_cap = (target_bytes // (8 * 4) // 128) * 128
    if user_tile_s is None:
        tile_s = lane_cap
    else:
        tile_s = _round_up(max(int(user_tile_s), 1), 128)
    tile_s = max(128, min(tile_s, _round_up(row_len, 128)))

    # Accumulator width: largest of {512, 256, 128} dividing tile_s.
    if tile_s % 512 == 0:
        acc_w = 512
    elif tile_s % 256 == 0:
        acc_w = 256
    else:
        acc_w = 128

    # Rows per block: multiple of 8 filling ~target bytes per grid step.
    r = target_bytes // (tile_s * 4)
    r = max(8, min(128, (r // 8) * 8))
    r = min(r, _round_up(rows_eff, 8))

    return n_split, row_len, rows_eff, tile_s, acc_w, int(r)


def pooling3_forward(x, w, b, *, tile_s=None,
                     target_block_bytes=4 * 1024 * 1024):
    """Forward pass of Pooling3.

    x: (N, C, D, H, W); w: (C, 2C) squeezed Conv3d(2C->C, 1x1x1) weight;
    b: (C,) bias.  Returns (N, C, 1, 1, 1) float32, matching Pooling3.forward.
    """
    N, C, D, H, W = x.shape
    S = D * H * W
    rows = N * C

    n_split, row_len, rows_eff, ts, acc_w, R = _plan(
        rows, S, tile_s, target_block_bytes)

    # Pure reshape (no data movement): (N, C, D, H, W) -> (rows_eff, row_len).
    x_rows = x.reshape(rows_eff, row_len)

    n_row_tiles = pl.cdiv(rows_eff, R)
    num_s = pl.cdiv(row_len, ts)
    rows_pad = n_row_tiles * R     # kernel may read past rows_eff on the last
                                   # row block; those garbage rows are sliced
                                   # off below (no jnp.pad copy of x needed).

    kernel = functools.partial(_pool_rows_kernel,
                               row_len=row_len, tile_s=ts, acc_w=acc_w)

    cost = pl.CostEstimate(
        flops=2 * rows_eff * row_len,
        transcendentals=0,
        bytes_accessed=x.size * x.dtype.itemsize + 2 * rows_pad * 4)

    sums, maxes = pl.pallas_call(
        kernel,
        out_shape=(jax.ShapeDtypeStruct((rows_pad, 1), jnp.float32),
                   jax.ShapeDtypeStruct((rows_pad, 1), jnp.float32)),
        grid_spec=pltpu.PrefetchScalarGridSpec(
            num_scalar_prefetch=0,
            grid=(n_row_tiles, num_s),
            in_specs=[pl.BlockSpec((R, ts), lambda r, s: (r, s))],
            out_specs=[pl.BlockSpec((R, 1), lambda r, s: (r, 0)),
                       pl.BlockSpec((R, 1), lambda r, s: (r, 0))],
            scratch_shapes=[pltpu.VMEM((R, acc_w), jnp.float32),   # running sum
                            pltpu.VMEM((R, acc_w), jnp.float32)],  # running max
        ),
        compiler_params=pltpu.CompilerParams(
            dimension_semantics=("parallel", "arbitrary"),
            vmem_limit_bytes=32 * 1024 * 1024),
        cost_estimate=cost,
    )(x_rows)

    # Combine per-split partials and discard row padding.
    sums = sums[:rows_eff, 0].reshape(N, C, n_split).sum(axis=-1)
    maxes = maxes[:rows_eff, 0].reshape(N, C, n_split).max(axis=-1)

    # Tiny O(N*C^2) epilogue kept outside the mem-bound streaming kernel (per
    # review).  The second AdaptiveAvgPool3d of an already (1,1,1) tensor is a
    # no-op; Conv3d(2C->C, 1x1x1) on cat([avg, max]) == feat @ W^T + b.
    avg = sums * jnp.float32(1.0 / S)
    feat = jnp.concatenate([avg, maxes], axis=1)                  # (N, 2C)
    y = jnp.maximum(feat @ w.astype(jnp.float32).T
                    + b.astype(jnp.float32), 0.0)                 # conv + ReLU
    out = jax.nn.sigmoid(y)                                       # Sigmoid
    return out.reshape(N, C, 1, 1, 1)


def _reference(x, w, b):
    avg = jnp.mean(x, axis=(2, 3, 4))
    mx = jnp.max(x, axis=(2, 3, 4))
    feat = jnp.concatenate([avg, mx], axis=1)
    y = jnp.maximum(feat @ w.T + b, 0.0)
    return jax.nn.sigmoid(y).reshape(x.shape[0], -1, 1, 1, 1)


if __name__ == "__main__":
    key = jax.random.PRNGKey(0)
    k_w, k_b, k1, k2, k3, k4 = jax.random.split(key, 6)

    # Shapes consistent with the module: in_planes = 4.
    C = 4
    fan_in = 2 * C                      # 1x1x1 kernel
    bound = 1.0 / (fan_in ** 0.5)
    w = jax.random.uniform(k_w, (C, 2 * C), minval=-bound, maxval=bound,
                           dtype=jnp.float32)
    b = jax.random.uniform(k_b, (C,), minval=-bound, maxval=bound,
                           dtype=jnp.float32)

    def _check(x, **kw):
        out = pooling3_forward(x, w, b, **kw)
        jax.block_until_ready(out)
        assert out.shape == (x.shape[0], C, 1, 1, 1)
        assert jnp.allclose(out, _reference(x, w, b), atol=1e-5, rtol=1e-5)

    # 1) Small spatial extent: single exact-fit tile, no split, no mask.
    _check(jax.random.normal(k1, (2, C, 4, 8, 8), dtype=jnp.float32))

    # 2) Forced multi-tile streaming path with a masked partial last tile
    #    (S = 320, tile_s = 128 -> 3 s-steps).
    _check(jax.random.normal(k2, (2, C, 5, 8, 8), dtype=jnp.float32),
           tile_s=128)

    # 3) Small batch (N=1): row-split path (n_split=2) for megacore, single
    #    s-tile per half, chunked fori_loop accumulation.
    x3 = jax.random.normal(k3, (1, C, 8, 16, 16), dtype=jnp.float32)
    _check(x3)

    # 4) Row-split path combined with multi-step streaming (2 s-steps/half).
    _check(x3, tile_s=512)

    # 5) Masked tail exercised together with >1 accumulator sub-chunks
    #    (S = 300 -> one 384-lane tile, acc_w = 128, 3 chunks).
    _check(jax.random.normal(k4, (2, C, 3, 10, 10), dtype=jnp.float32))

    print("KERNEL_OK")
</pallas_src>

<mosaic_0001>
module attributes {stable_mosaic.version = 11 : i64} {
  func.func @_pool_rows_kernel(%arg0: i32, %arg1: i32, %arg2: memref<8x256xf32, #tpu.memory_space<vmem>>, %arg3: memref<8x1xf32, #tpu.memory_space<vmem>>, %arg4: memref<8x1xf32, #tpu.memory_space<vmem>>, %arg5: memref<8x256xf32, #tpu.memory_space<vmem>>, %arg6: memref<8x256xf32, #tpu.memory_space<vmem>>) attributes {dimension_semantics = [#tpu.dimension_semantics<parallel>, #tpu.dimension_semantics<arbitrary>], iteration_bounds = array<i64: 1, 1>, scalar_prefetch = 0 : i64, scratch_operands = 2 : i64, tpu.core_type = #tpu.core_type<tc>, window_params = [{transform_indices = @transform_0, window_bounds = array<i64: 8, 256>}, {transform_indices = @transform_1, window_bounds = array<i64: 8, 1>}, {transform_indices = @transform_2, window_bounds = array<i64: 8, 1>}]} {
    %c0_i32 = arith.constant 0 : i32
    %0 = arith.cmpi eq, %arg1, %c0_i32 : i32
    %1 = arith.extui %0 : i1 to i32
    %c0_i32_0 = arith.constant 0 : i32
    %2 = arith.cmpi ne, %1, %c0_i32_0 : i32
    scf.if %2 {
      %cst = arith.constant 0.000000e+00 : f32
      %16 = vector.broadcast %cst : f32 to vector<8x256xf32>
      %c0_12 = arith.constant 0 : index
      %c0_13 = arith.constant 0 : index
      %17 = vector.load %arg5[%c0_12, %c0_13] : memref<8x256xf32, #tpu.memory_space<vmem>>, vector<8x256xf32>
      tpu.vector_store %arg5[%c0_12, %c0_13], %16 {strides = array<i32>} : memref<8x256xf32, #tpu.memory_space<vmem>>, vector<8x256xf32>,
      %cst_14 = arith.constant 0xFF800000 : f32
      %18 = vector.broadcast %cst_14 : f32 to vector<8x256xf32>
      %c0_15 = arith.constant 0 : index
      %c0_16 = arith.constant 0 : index
      %19 = vector.load %arg6[%c0_15, %c0_16] : memref<8x256xf32, #tpu.memory_space<vmem>>, vector<8x256xf32>
      tpu.vector_store %arg6[%c0_15, %c0_16], %18 {strides = array<i32>} : memref<8x256xf32, #tpu.memory_space<vmem>>, vector<8x256xf32>,
    } else {
    }
    %c0 = arith.constant 0 : index
    %c0_1 = arith.constant 0 : index
    %3 = vector.load %arg5[%c0, %c0_1] : memref<8x256xf32, #tpu.memory_space<vmem>>, vector<8x256xf32>
    %c0_2 = arith.constant 0 : index
    %c0_3 = arith.constant 0 : index
    %4 = vector.load %arg6[%c0_2, %c0_3] : memref<8x256xf32, #tpu.memory_space<vmem>>, vector<8x256xf32>
    %c0_i32_4 = arith.constant 0 : i32
    %c256_i32 = arith.constant 256 : i32
    %5 = arith.muli %c0_i32_4, %c256_i32 : i32
    %6 = tpu.assume_multiple %5, 256 : i32
    %c0_5 = arith.constant 0 : index
    %7 = arith.index_cast %6 : i32 to index
    %8 = vector.load %arg2[%c0_5, %7] : memref<8x256xf32, #tpu.memory_space<vmem>>, vector<8x256xf32>
    %9 = arith.addf %3, %8 : vector<8x256xf32>
    %10 = arith.maximumf %4, %8 : vector<8x256xf32>
    %c1_i32 = arith.constant 1 : i32
    %c0_6 = arith.constant 0 : index
    %c0_7 = arith.constant 0 : index
    %11 = vector.load %arg5[%c0_6, %c0_7] : memref<8x256xf32, #tpu.memory_space<vmem>>, vector<8x256xf32>
    tpu.vector_store %arg5[%c0_6, %c0_7], %9 {strides = array<i32>} : memref<8x256xf32, #tpu.memory_space<vmem>>, vector<8x256xf32>,
    %c0_8 = arith.constant 0 : index
    %c0_9 = arith.constant 0 : index
    %12 = vector.load %arg6[%c0_8, %c0_9] : memref<8x256xf32, #tpu.memory_space<vmem>>, vector<8x256xf32>
    tpu.vector_store %arg6[%c0_8, %c0_9], %10 {strides = array<i32>} : memref<8x256xf32, #tpu.memory_space<vmem>>, vector<8x256xf32>,
    %c0_i32_10 = arith.constant 0 : i32
    %13 = arith.cmpi eq, %arg1, %c0_i32_10 : i32
    %14 = arith.extui %13 : i1 to i32
    %c0_i32_11 = arith.constant 0 : i32
    %15 = arith.cmpi ne, %14, %c0_i32_11 : i32
    scf.if %15 {
      %c0_12 = arith.constant 0 : index
      %c0_13 = arith.constant 0 : index
      %16 = vector.load %arg5[%c0_12, %c0_13] : memref<8x256xf32, #tpu.memory_space<vmem>>, vector<8x256xf32>
      %cst = arith.constant dense<0.000000e+00> : vector<8xf32>
      %17 = vector.multi_reduction <add>, %16, %cst [1] : vector<8x256xf32> to vector<8xf32>
      %18 = vector.shape_cast %17 : vector<8xf32> to vector<8x1xf32>
      %c0_14 = arith.constant 0 : index
      %c0_15 = arith.constant 0 : index
      %19 = vector.load %arg3[%c0_14, %c0_15] : memref<8x1xf32, #tpu.memory_space<vmem>>, vector<8x1xf32>
      tpu.vector_store %arg3[%c0_14, %c0_15], %18 {strides = array<i32>} : memref<8x1xf32, #tpu.memory_space<vmem>>, vector<8x1xf32>,
      %c0_16 = arith.constant 0 : index
      %c0_17 = arith.constant 0 : index
      %20 = vector.load %arg6[%c0_16, %c0_17] : memref<8x256xf32, #tpu.memory_space<vmem>>, vector<8x256xf32>
      %cst_18 = arith.constant dense<0xFF800000> : vector<8xf32>
      %21 = vector.multi_reduction <maximumf>, %20, %cst_18 [1] : vector<8x256xf32> to vector<8xf32>
      %22 = vector.shape_cast %21 : vector<8xf32> to vector<8x1xf32>
      %c0_19 = arith.constant 0 : index
      %c0_20 = arith.constant 0 : index
      %23 = vector.load %arg4[%c0_19, %c0_20] : memref<8x1xf32, #tpu.memory_space<vmem>>, vector<8x1xf32>
      tpu.vector_store %arg4[%c0_19, %c0_20], %22 {strides = array<i32>} : memref<8x1xf32, #tpu.memory_space<vmem>>, vector<8x1xf32>,
    } else {
    }
    return
  }
  func.func @transform_0(%arg0: i32, %arg1: i32) -> (i32, i32) {
    %c0_i32 = arith.constant 0 : i32
    return %arg0, %arg1 : i32, i32
  }
  func.func @transform_1(%arg0: i32, %arg1: i32) -> (i32, i32) {
    %c0_i32 = arith.constant 0 : i32
    %c0_i32_0 = arith.constant 0 : i32
    return %arg0, %c0_i32 : i32, i32
  }
  func.func @transform_2(%arg0: i32, %arg1: i32) -> (i32, i32) {
    %c0_i32 = arith.constant 0 : i32
    %c0_i32_0 = arith.constant 0 : i32
    return %arg0, %c0_i32 : i32, i32
  }
}

</mosaic_0001>

<bundles_post_ra>
// kernel: tpu_custom_call.1
= control target key start
LH: loop header
LB: loop body
LE: loop exit
PB: predicated region body
PF: predicated region fallthrough
CT: control target
= control target key end

     0   :  { %8 = vsyncpa [#allocation5], 0  ;;  %s92_s9 = smov [#allocation4]   ;;  %s117_s0 = inlined_call_operand.hbm [shape: f32[8,256], index: 0, kind: input, shape index: {}]   ;;  %s118_s1 = inlined_call_operand.vmem [shape: f32[8,1], index: 1, kind: output, shape index: {0}]   ;;  %s119_s2 = inlined_call_operand.vmem [shape: f32[8,1], index: 2, kind: output, shape index: {1}]  }
   0x1   :  { %s15_s10 = sshll.u32 %s92_s9, 4  ;;  %s16_s10 = int_to_ptr.vmem [resolvable:$true] %s15_s10 }
   0x2   :  { %s78_s11 = scalar_lea.vmem %s16_s10, 256  ;;  %p83_p1 = scmp.lt.s32.totalorder %s16_s10, %s16_s10 }
   0x3   :  { %p79_p0 = scmp.ne.s32.totalorder %s16_s10, %s78_s11  ;;  %p84_p2 = scmp.lt.s32.totalorder %s78_s11, %s78_s11 }
   0x5   :  { %p85_p3 = por %p84_p2, %p83_p1 }
   0x7   :  { %p86_p4 = pnand %p85_p3, %p79_p0 }
   0x9   :  { %89 = shalt.err (!%p86_p4)
}
   0xa   :  { %18 = dma.hbm_to_vmem [thread:$0]  %s117_s0, 256, %s16_s10, [#allocation5]  }
   0xb   :  { %90 = dma.done.wait [#allocation5], 256  }
   0xc   :  { %91 = vsyncadd [#allocation5], 4294967040  ;;  %v34_v0 = vld [vmem:[#allocation4] sm:$0xff]  ;;  %v35_v1 = vld [vmem:[#allocation4 + $0x8] sm:$0xff]  ;;  %vm52_vm0 = vcmask 7168  }
   0xd   :  { %v49_v2 = vadd.f32 %v35_v1, %v34_v0  ;;  %v56_v3 = vmax.f32 %v34_v0, %v35_v1 }
   0xf   :  { %50 = vadd.xlane.f32.xlu0 %v49_v2 }
  0x13   :  { %57 = vmax.xlane.f32.xlu0 %v56_v3 }
  0x98   :  { %v51_v4 = vpop.xlane.xlu0 %50 }
  0x99   :  { %53 = vst.msk [vmem:[%s118_s1] sm:$0xff] %vm52_vm0, %v51_v4 }
  0x9c   :  { %v58_v5 = vpop.xlane.xlu0 %57 }
  0x9d   :  { %59 = vst.msk [vmem:[%s119_s2] sm:$0xff] %vm52_vm0, %v58_v5 }
  0x9e   :  { %68 = vsyncpa [#allocation5], 1 }

</bundles_post_ra>
